<compile_context>
chip_gen: v5e
topology: v5e:2x2
jax: 0.10.0
libtpu: 0.0.40
codegen_flags: <defaults>
</compile_context>

<pallas_src>
import jax
import jax.numpy as jnp
from jax.experimental import pallas as pl
from jax.experimental.pallas import tpu as pltpu


# ----------------------------- Pallas kernel ------------------------------ #
def _linear_kernel(x_ref, w_ref, b_ref, o_ref):
    # x_ref: (tm, tk) f32, w_ref: (tk, tn) bf16, b_ref: (1, tn) f32,
    # o_ref: (tm, tn) f32 -- resident across the K axis (its index_map ignores
    # k), so it doubles as the accumulator: no VMEM scratch, no epilogue.
    k = pl.program_id(2)

    @pl.when(k == 0)
    def _init():
        # Initialize the accumulator with the broadcast bias (added once).
        o_ref[...] = jnp.broadcast_to(b_ref[...], o_ref.shape)

    # Cast the activation tile to bf16 in-kernel (MXU peak dtype) and
    # accumulate in f32 directly into the resident output block.
    o_ref[...] += jnp.dot(
        x_ref[...].astype(jnp.bfloat16),
        w_ref[...],
        preferred_element_type=jnp.float32,
    )


# ------------------------------ host helpers ------------------------------- #
def _round_up(x, m):
    return ((x + m - 1) // m) * m


def _pad2d(a, target_shape):
    pads = [(0, t - s) for s, t in zip(a.shape, target_shape)]
    if any(p[1] for p in pads):
        a = jnp.pad(a, pads)
    return a


# v7x-safe budget (64 MiB physical VMEM there); ample headroom on v5e/v6e.
_VMEM_BUDGET = 48 * 1024 * 1024


def _pick_tiles(Mp, Np, Kp):
    """MXU/lane-aligned tiles under a v7x-safe VMEM budget."""

    def largest(dim, cands=(512, 256, 128)):
        for c in cands:
            if dim % c == 0:
                return c
        return 128

    tm = largest(Mp)
    tn = largest(Np)
    # Keep at least 2 parallel output blocks so both v7x TensorCores get work
    # (harmless on single-TC v5e/v6e).
    if (Mp // tm) * (Np // tn) < 2:
        for c in (256, 128):
            if Np % c == 0 and Np // c >= 2:
                tn = c
                break

    # Largest K tile dividing Kp whose double-buffered footprint fits:
    #   2 * (tm*tk*4 [f32 x] + tk*tn*2 [bf16 w] + tn*4 [bias] + tm*tn*4 [out])
    tk = 128
    for cand in (2048, 1024, 512, 256, 128):
        if Kp % cand:
            continue
        fp = 2 * (tm * cand * 4 + cand * tn * 2 + tn * 4 + tm * tn * 4)
        if fp <= _VMEM_BUDGET:
            tk = cand
            break
    footprint = 2 * (tm * tk * 4 + tk * tn * 2 + tn * 4 + tm * tn * 4)
    return tm, tn, tk, footprint


@jax.jit
def pallas_linear(x2d, w_padded, b_padded):
    """y = x2d @ W + b with a tiled, pipelined Pallas TPU matmul.

    w_padded: (Kp, Np) bf16, b_padded: (1, Np) f32 -- pre-cast / pre-padded
    once at model init, so the per-call path only moves the activation.
    Returns a (Mp, Np) f32 result (rows beyond M are padding; caller slices N
    if it padded the weights).
    """
    M, K = x2d.shape
    Kp, Np = w_padded.shape
    assert Kp >= K

    Mp = _round_up(M, 128)
    tm, tn, tk, footprint = _pick_tiles(Mp, Np, Kp)

    # Zero-pad the activation only if needed (exact for matmul); the demo
    # shapes are already aligned so this is a no-op.
    xp = _pad2d(x2d.astype(jnp.float32), (Mp, Kp))

    out = pl.pallas_call(
        _linear_kernel,
        out_shape=jax.ShapeDtypeStruct((Mp, Np), jnp.float32),
        grid_spec=pltpu.PrefetchScalarGridSpec(
            num_scalar_prefetch=0,
            grid=(Mp // tm, Np // tn, Kp // tk),
            in_specs=[
                pl.BlockSpec((tm, tk), lambda i, j, k: (i, k)),  # X (f32)
                pl.BlockSpec((tk, tn), lambda i, j, k: (k, j)),  # W (bf16)
                pl.BlockSpec((1, tn), lambda i, j, k: (0, j)),   # bias (f32)
            ],
            out_specs=pl.BlockSpec((tm, tn), lambda i, j, k: (i, j)),
        ),
        compiler_params=pltpu.CompilerParams(
            dimension_semantics=("parallel", "parallel", "arbitrary"),
            vmem_limit_bytes=min(
                _VMEM_BUDGET, max(32 * 1024 * 1024, 2 * footprint)
            ),
        ),
    )(xp, w_padded, b_padded)

    return out[:M] if Mp != M else out


# ------------------------- Wrapped "model" module -------------------------- #
class LinearModel:
    """Deterministic stand-in for the wrapped nn.Module (a Linear layer)."""

    def __init__(self, hidden, out):
        kw, kb = jax.random.split(jax.random.PRNGKey(42))
        scale = 1.0 / (hidden ** 0.5)
        self.w = (jax.random.uniform(kw, (hidden, out), jnp.float32) * 2 - 1) * scale
        self.b = (jax.random.uniform(kb, (1, out), jnp.float32) * 2 - 1) * scale
        self.out_features = out

        # Weights-stationary preprocessing, done ONCE (hoisted out of the
        # per-call path): bf16 cast + pad K/N to lane-aligned multiples.
        Kp = _round_up(hidden, 128)
        Np = _round_up(out, 128)
        self.w_padded = jax.device_put(
            _pad2d(self.w.astype(jnp.bfloat16), (Kp, Np))
        )
        self.b_padded = jax.device_put(
            _pad2d(self.b.astype(jnp.float32), (1, Np))
        )

    def __call__(self, x):
        # x: [B, S, H] -> flatten to [B*S, H], run the Pallas matmul, reshape.
        B, S, H = x.shape
        y2d = pallas_linear(x.reshape(B * S, H), self.w_padded, self.b_padded)
        if y2d.shape[1] != self.out_features:
            y2d = y2d[:, : self.out_features]
        return y2d.reshape(B, S, self.out_features)


class CacheInputOutput:
    """JAX/Python port of the PyTorch CacheInputOutput wrapper."""

    def __init__(self, model):
        self.model = model
        self.output = None
        self.args = ()
        self.kwargs = {}

    def __call__(self, *args, **kwargs):
        self.args = args
        self.kwargs = kwargs
        self.output = self.model(*args, **kwargs)
        return self.output


# ---------------------------------- main ----------------------------------- #
if __name__ == "__main__":
    # M = B*S = 128 (one 128-row tile), K = 1024 (single K step, tk=1024),
    # N = 256 (two lane-dense 128-wide output tiles -> 2 parallel blocks).
    B, S, H, O = 2, 64, 1024, 256
    x = jax.random.normal(jax.random.PRNGKey(0), (B, S, H), jnp.float32)

    inner = LinearModel(H, O)
    wrapper = CacheInputOutput(inner)

    out = wrapper(x)
    out = jax.block_until_ready(out)

    # Caching semantics of the wrapper (the actual spec of CacheInputOutput).
    assert wrapper.args[0] is x
    assert wrapper.kwargs == {}
    assert wrapper.output is out
    assert out.shape == (B, S, O)

    # Numerical correctness vs. a pure-JAX reference using the same
    # bf16-inputs / f32-accumulation recipe as the kernel.
    x2d = x.reshape(B * S, H)
    ref = (
        jnp.dot(
            x2d.astype(jnp.bfloat16),
            inner.w.astype(jnp.bfloat16),
            preferred_element_type=jnp.float32,
        )
        + inner.b
    )
    max_err = float(jnp.max(jnp.abs(out.reshape(B * S, O) - ref)))
    assert max_err < 1e-2, f"max abs err {max_err}"

    print("KERNEL_OK")
</pallas_src>

<mosaic_0001>
module attributes {stable_mosaic.version = 11 : i64} {
  func.func @_linear_kernel(%arg0: i32, %arg1: i32, %arg2: i32, %arg3: memref<128x1024xf32, #tpu.memory_space<vmem>>, %arg4: memref<1024x128xbf16, #tpu.memory_space<vmem>>, %arg5: memref<1x128xf32, #tpu.memory_space<vmem>>, %arg6: memref<128x128xf32, #tpu.memory_space<vmem>>) attributes {dimension_semantics = [#tpu.dimension_semantics<parallel>, #tpu.dimension_semantics<parallel>, #tpu.dimension_semantics<arbitrary>], iteration_bounds = array<i64: 1, 2, 1>, scalar_prefetch = 0 : i64, scratch_operands = 0 : i64, tpu.core_type = #tpu.core_type<tc>, window_params = [{transform_indices = @transform_0, window_bounds = array<i64: 128, 1024>}, {transform_indices = @transform_1, window_bounds = array<i64: 1024, 128>}, {transform_indices = @transform_2, window_bounds = array<i64: 1, 128>}, {transform_indices = @transform_3, window_bounds = array<i64: 128, 128>}]} {
    %c0_i32 = arith.constant 0 : i32
    %0 = arith.cmpi eq, %arg2, %c0_i32 : i32
    %1 = arith.extui %0 : i1 to i32
    %c0_i32_0 = arith.constant 0 : i32
    %2 = arith.cmpi ne, %1, %c0_i32_0 : i32
    scf.if %2 {
      %c0_8 = arith.constant 0 : index
      %c0_9 = arith.constant 0 : index
      %10 = vector.load %arg5[%c0_8, %c0_9] : memref<1x128xf32, #tpu.memory_space<vmem>>, vector<1x128xf32>
      %11 = vector.shape_cast %10 : vector<1x128xf32> to vector<1x128xf32>
      %12 = vector.broadcast %11 : vector<1x128xf32> to vector<128x128xf32>
      %c0_10 = arith.constant 0 : index
      %c0_11 = arith.constant 0 : index
      %13 = vector.load %arg6[%c0_10, %c0_11] : memref<128x128xf32, #tpu.memory_space<vmem>>, vector<128x128xf32>
      tpu.vector_store %arg6[%c0_10, %c0_11], %12 {strides = array<i32>} : memref<128x128xf32, #tpu.memory_space<vmem>>, vector<128x128xf32>,
    } else {
    }
    %c0 = arith.constant 0 : index
    %c0_1 = arith.constant 0 : index
    %3 = vector.load %arg6[%c0, %c0_1] : memref<128x128xf32, #tpu.memory_space<vmem>>, vector<128x128xf32>
    %c0_2 = arith.constant 0 : index
    %c0_3 = arith.constant 0 : index
    %4 = vector.load %arg3[%c0_2, %c0_3] : memref<128x1024xf32, #tpu.memory_space<vmem>>, vector<128x1024xf32>
    %5 = arith.truncf %4 : vector<128x1024xf32> to vector<128x1024xbf16>
    %c0_4 = arith.constant 0 : index
    %c0_5 = arith.constant 0 : index
    %6 = vector.load %arg4[%c0_4, %c0_5] : memref<1024x128xbf16, #tpu.memory_space<vmem>>, vector<1024x128xbf16>
    %cst = arith.constant dense<0.000000e+00> : vector<128x128xf32>
    %7 = tpu.matmul %5, %6, %cst {dimension_numbers = #tpu.dot_dimension_numbers<[1], [0], [0], [1], [0, 0, 1, 1], [], []>} : vector<128x1024xbf16>, vector<1024x128xbf16>, vector<128x128xf32> -> vector<128x128xf32>
    %8 = arith.addf %3, %7 : vector<128x128xf32>
    %c0_6 = arith.constant 0 : index
    %c0_7 = arith.constant 0 : index
    %9 = vector.load %arg6[%c0_6, %c0_7] : memref<128x128xf32, #tpu.memory_space<vmem>>, vector<128x128xf32>
    tpu.vector_store %arg6[%c0_6, %c0_7], %8 {strides = array<i32>} : memref<128x128xf32, #tpu.memory_space<vmem>>, vector<128x128xf32>,
    return
  }
  func.func @transform_0(%arg0: i32, %arg1: i32, %arg2: i32) -> (i32, i32) {
    %c0_i32 = arith.constant 0 : i32
    return %arg0, %arg2 : i32, i32
  }
  func.func @transform_1(%arg0: i32, %arg1: i32, %arg2: i32) -> (i32, i32) {
    %c0_i32 = arith.constant 0 : i32
    return %arg2, %arg1 : i32, i32
  }
  func.func @transform_2(%arg0: i32, %arg1: i32, %arg2: i32) -> (i32, i32) {
    %c0_i32 = arith.constant 0 : i32
    %c0_i32_0 = arith.constant 0 : i32
    return %c0_i32, %arg1 : i32, i32
  }
  func.func @transform_3(%arg0: i32, %arg1: i32, %arg2: i32) -> (i32, i32) {
    %c0_i32 = arith.constant 0 : i32
    return %arg0, %arg1 : i32, i32
  }
}

</mosaic_0001>

<bundles_post_ra>
// kernel: pallas_linear.1
= control target key start
LH: loop header
LB: loop body
LE: loop exit
PB: predicated region body
PF: predicated region fallthrough
CT: control target
= control target key end

     0   :  { %8 = vsyncpa [#allocation3], 0  ;;  %s2545_s0 = inlined_call_operand.hbm [shape: f32[128,1024], index: 0, kind: input, shape index: {}]   ;;  %s2546_s1 = inlined_call_operand.hbm [shape: bf16[1024,256], index: 1, kind: input, shape index: {}]   ;;  %s2547_s2 = inlined_call_operand.hbm [shape: f32[1,256], index: 2, kind: input, shape index: {}]   ;;  %s2548_s3 = inlined_call_operand.hbm [shape: f32[128,256], index: 3, kind: output, shape index: {}]  }
   0x1   :  { %9 = vsyncpa [#allocation6], 0 }
   0x2   :  { %11 = vsyncpa [#allocation6 + $0x1], 0 }
   0x3   :  { %12 = vsyncpa [#allocation4], 0 }
   0x4   :  { %14 = vsyncpa [#allocation4 + $0x1], 0  ;;  %s2216_s12 = smov 0   ;;  %s2218_s13 = smov 0  }
   0x5   :  { %s2220_s14 = smov 0   ;;  %s2222_s15 = smov 0  }
   0x6   :  { %s2224_s16 = smov 0   ;;  %s2226_s17 = smov 0  }
   0x7 LB: > { %s35_s18 = sadd.s32 1, %s2182_s16  ;;  %s76_s19 = sadd.s32 1, %s2174_s14  ;;  %s2186_s17 = sphi %s2226_s17, %s20_s17   ;;  %s2182_s16 = sphi %s2224_s16, %s2559_s16   ;;  %s2178_s15 = sphi %s2222_s15, %s2558_s15   ;;  %s2174_s14 = sphi %s2220_s14, %s2557_s14   ;;  %s2170_s13 = sphi %s2218_s13, %s2556_s13   ;;  %s2166_s12 = sphi %s2216_s12, %s2555_s12  }
   0x8   : > { %p37_p0 = scmp.ge.s32.totalorder %s35_s18, 2  ;;  %p83_p1 = scmp.ne.s32.totalorder %s2174_s14, %s2170_s13 }
   0x9   : > { %p84_p2 = scmp.eq.s32.totalorder %s2186_s17, 0  ;;  %p1593_p4 = scmp.ge.s32.totalorder %s2186_s17, 2 }
   0xa   : > { %s2561_s18 = smov (%p37_p0, %s35_s18), 0  ;;  %p1950_p5 = scmp.lt.s32.totalorder %s2186_s17, 2 }
   0xb   : > { %p2256_p3 = por %p84_p2, %p83_p1  ;;  %s72_s21 = ssub.s32 %s2182_s16, %s2561_s18 }
   0xc   : > { %p74_p6 = scmp.eq.s32.totalorder %s72_s21, 0  ;;  %s187_s22 = sand.u32 1, %s2186_s17  }
   0xd   : > { %s189_s23 = sand.u32 1, %s2174_s14   ;;  %s1595_s26 = sshll.u32 %s2182_s16, 2 }
   0xe   : > { %s2267_s24 = scalar_select %p74_p6, %s2174_s14, %s76_s19  }
   0xf   : > { %s1594_s25 = sshll.u32 %s189_s23, 9  ;;  %s198_s29 = scalar_lea.hbm %s2546_s1, %s1595_s26 }
  0x10   : > { %s199_s30 = sshll.u32 %s198_s29, 4  ;;  %s191_s4 = scalar_lea.vmem [#allocation5], %s1594_s25  ;;  %s200_s30 = int_to_ptr.hbm [resolvable:$true] %s199_s30 }
  0x11   : > { %s201_s5 = sshll.u32 %s191_s4, 4  ;;  %p2279_p7 = pnand %p1950_p5, %p2256_p3  ;;  %s202_s5 = int_to_ptr.vmem [resolvable:$true] %s201_s5 }
  0x12   : > { %s2283_s7 = scalar_lea.sflag [#allocation6], %s187_s22  ;;  %s2188_s8 = smov 128  }
  0x13   : > { %s2189_s9 = smov 64   ;;  %s2190_s10 = smov 4  }
  0x14   : > { %1941 = dma.hbm_to_vmem [thread:$0]  (!%p2279_p7), %s200_s30, 8192, %s202_s5, %s2283_s7, %s2188_s8, %s2189_s9, %s2190_s10  }
  0x15   : > { %s2290_s11 = sadd.s32 4294967295, %s2186_s17   ;;  %s1590_s19 = sadd.s32 4294967294, %s2186_s17  }
  0x16   : > { %p89_p8 = scmp.ne.s32.totalorder %s2170_s13, %s2166_s12  ;;  %p90_p9 = scmp.eq.s32.totalorder %s2290_s11, 0 }
  0x17   : > { %p141_p10 = scmp.eq.s32.totalorder %s2290_s11, 1  ;;  %p147_p11 = scmp.eq.s32.totalorder %s1590_s19, 1 }
  0x18   : > { %p2299_p12 = por %p90_p9, %p89_p8  ;;  %p1591_p13 = scmp.ge.s32.totalorder %s2186_s17, 1 }
  0x19   : > { %p2307_p0 = por %p141_p10, %p83_p1  ;;  %p2311_p2 = por %p147_p11, %p89_p8 }
  0x1a   : > { %p154_p3 = scmp.lt.s32.totalorder %s2186_s17, 3  ;;  %s171_s27 = sshll.u32 %s2545_s0, 4  ;;  %s172_s27 = int_to_ptr.hbm [resolvable:$true] %s171_s27 }
  0x1b   : > { %s2191_s29 = smov [#allocation2]   ;;  %s217_s8 = scalar_lea.hbm %s2547_s2, %s2182_s16 }
  0x1c   : > { %p2319_p5 = pnand %p1591_p13, %p154_p3  ;;  %s173_s30 = sshll.u32 %s2191_s29, 4  ;;  %s174_s30 = int_to_ptr.vmem [resolvable:$true] %s173_s30 }
  0x1d   : > { %s219_s10 = sshll.u32 %s217_s8, 4  ;;  %s214_s19 = scalar_lea.vmem [#allocation7], %s189_s23  ;;  %s220_s10 = int_to_ptr.hbm [resolvable:$true] %s219_s10 }
  0x1e   : > { %p1934_p1 = pneg %p2319_p5  ;;  %s221_s25 = sshll.u32 %s214_s19, 4  ;;  %s222_s25 = int_to_ptr.vmem [resolvable:$true] %s221_s25 }
  0x1f   : > { %s2192_s26 = smov 1024   ;;  %230 = sbr.rel (%p2319_p5) target bundleno = 466 (0x1d2), region = 32 }
  0x20   : > { %p1935_p6 = pnand %p1934_p1, %p90_p9 }
  0x21   : > { %1944 = dma.hbm_to_vmem [thread:$0]  (!%p2279_p7), %s220_s10, 16, %s222_s25, %s2283_s7  }
  0x22   : > { %1937 = dma.hbm_to_vmem [thread:$0]  (!%p1935_p6), %s172_s27, 16384, %s174_s30, [#allocation3], %s2192_s26, %s2192_s26, %s2189_s9  }
  0x24   : > { %2153 = dma.done.wait (%p90_p9), [#allocation3], 16384  }
  0x25   : > { %2155 = vsyncadd (%p90_p9), [#allocation3], 4294950912  ;;  %s237_s23 = sand.u32 1, %s2290_s11   ;;  %s2345_s29 = sand.u32 1, %s2170_s13  }
  0x26   : > { %s1598_s4 = sshll.u32 %s2345_s29, 9  ;;  %s238_s9 = scalar_lea.sflag [#allocation6], %s237_s23 }
  0x27   : > { %s2348_s6 = scalar_lea.vmem [#allocation5], %s1598_s4 }
  0x28   : > { %2157 = dma.done.wait (%p2299_p12), %s238_s9, 8208  }
  0x29   : > { %2159 = vsyncadd (%p2299_p12), %s238_s9, 4294959088  ;;  %v1867_v0 = vld [vmem:[%s2348_s6 + $0x38] sm:$0xff]  ;;  %v1866_v4 = vld [vmem:[%s2348_s6 + $0x30] sm:$0xff]  ;;  %s250_s7 = scalar_lea.vmem [#allocation7], %s2345_s29  ;;  %s1599_s11 = sshll.u32 %s2345_s29, 7 }
  0x2a   : > { %v1875_v1 = vld [vmem:[%s2348_s6 + $0x78] sm:$0xff]  ;;  %1026 = vmatpush.bf16.msra.mxu0 %v1867_v0  ;;  %v1874_v5 = vld [vmem:[%s2348_s6 + $0x70] sm:$0xff]  ;;  %v1865_v8 = vld [vmem:[%s2348_s6 + $0x28] sm:$0xff]  ;;  %s2459_s20 = scalar_lea.vmem [#allocation8], %s1599_s11  ;;  %s1857_s27 = sshll.u32 %s2178_s15, 3 }
  0x2b   : > { %v1883_v2 = vld [vmem:[%s2348_s6 + $0xb8] sm:$0xff]  ;;  %1075 = vmatpush.bf16.msra.mxu1 %v1875_v1  ;;  %v1882_v6 = vld [vmem:[%s2348_s6 + $0xb0] sm:$0xff]  ;;  %v1873_v9 = vld [vmem:[%s2348_s6 + $0x68] sm:$0xff]  ;;  %s1464_s5 = scalar_lea.hbm %s2548_s3, %s1857_s27  ;;  %s1465_s8 = sshll.u32 %s2459_s20, 4  ;;  %s1466_s8 = int_to_ptr.vmem [resolvable:$true] %s1465_s8 }
  0x2c   : > { %v1891_v3 = vld [vmem:[%s2348_s6 + $0xf8] sm:$0xff]  ;;  %1124 = vmatpush.bf16.msra.mxu2 %v1883_v2  ;;  %v1890_v7 = vld [vmem:[%s2348_s6 + $0xf0] sm:$0xff]  ;;  %v1881_v10 = vld [vmem:[%s2348_s6 + $0xa8] sm:$0xff]  ;;  %s1467_s10 = sshll.u32 %s1464_s5, 4  ;;  %s1451_s15 = scalar_lea.sflag [#allocation4], %s2345_s29  ;;  %s1468_s10 = int_to_ptr.hbm [resolvable:$true] %s1467_s10 }
  0x2d   : > { %1173 = vmatpush.bf16.msra.mxu3 %v1891_v3  ;;  %v1889_v11 = vld [vmem:[%s2348_s6 + $0xe8] sm:$0xff]  ;;  %v1864_v12 = vld [vmem:[%s2348_s6 + $0x20] sm:$0xff]  ;;  %v1863_v16 = vld [vmem:[%s2348_s6 + $0x18] sm:$0xff]  ;;  %s2114_s19 = sshra.s32 %s1468_s10, 4  ;;  %s2120_s4 = scalar_lea.hbm %s2548_s3, 256  ;;  %s2115_s19 = int_to_ptr.hbm [resolvable:$true] %s2114_s19 }
  0x2e   : > { %1027 = vmatpush.bf16.msra.mxu0 %v1866_v4  ;;  %v1872_v13 = vld [vmem:[%s2348_s6 + $0x60] sm:$0xff]  ;;  %v1871_v17 = vld [vmem:[%s2348_s6 + $0x58] sm:$0xff]  ;;  %v1862_v20 = vld [vmem:[%s2348_s6 + $0x10] sm:$0xff]  ;;  %s2116_s25 = scalar_lea.hbm %s2115_s19, 128  ;;  %p2121_p10 = scmp.lt.s32.totalorder %s2115_s19, %s2548_s3 }
  0x2f   : > { %1076 = vmatpush.bf16.msra.mxu1 %v1874_v5  ;;  %v1880_v14 = vld [vmem:[%s2348_s6 + $0xa0] sm:$0xff]  ;;  %v1879_v18 = vld [vmem:[%s2348_s6 + $0x98] sm:$0xff]  ;;  %v1870_v21 = vld [vmem:[%s2348_s6 + $0x50] sm:$0xff]  ;;  %p2117_p7 = scmp.ne.s32.totalorder %s2115_s19, %s2116_s25  ;;  %p2122_p11 = scmp.lt.s32.totalorder %s2120_s4, %s2116_s25 }
  0x30   : > { %1125 = vmatpush.bf16.msra.mxu2 %v1882_v6  ;;  %v1888_v15 = vld [vmem:[%s2348_s6 + $0xe0] sm:$0xff]  ;;  %v1887_v19 = vld [vmem:[%s2348_s6 + $0xd8] sm:$0xff]  ;;  %v1878_v22 = vld [vmem:[%s2348_s6 + $0x90] sm:$0xff] }
  0x31   : > { %1174 = vmatpush.bf16.msra.mxu3 %v1890_v7  ;;  %v1886_v23 = vld [vmem:[%s2348_s6 + $0xd0] sm:$0xff]  ;;  %v1861_v24 = vld [vmem:[%s2348_s6 + $0x8] sm:$0xff]  ;;  %v1860_v28 = vld [vmem:[%s2348_s6] sm:$0xff]  ;;  %p2118_p8 = pnand %p2117_p7, %p2307_p0  ;;  %p2123_p12 = por %p2122_p11, %p2121_p10 }
  0x32   : > { %1028 = vmatpush.bf16.msra.mxu0 %v1865_v8  ;;  %v1869_v25 = vld [vmem:[%s2348_s6 + $0x48] sm:$0xff]  ;;  %v1868_v29 = vld [vmem:[%s2348_s6 + $0x40] sm:$0xff]  ;;  %v324_v36 = vld [vmem:[#allocation2 + $0x10] sm:$0xff] }
  0x33   : > { %1077 = vmatpush.bf16.msra.mxu1 %v1873_v9  ;;  %v1877_v26 = vld [vmem:[%s2348_s6 + $0x88] sm:$0xff]  ;;  %v1876_v30 = vld [vmem:[%s2348_s6 + $0x80] sm:$0xff]  ;;  %v332_v37 = vld [vmem:[#allocation2 + $0x50] sm:$0xff]  ;;  %p2119_p9 = pneg %p2118_p8 }
  0x34   : > { %1126 = vmatpush.bf16.msra.mxu2 %v1881_v10  ;;  %v1885_v27 = vld [vmem:[%s2348_s6 + $0xc8] sm:$0xff]  ;;  %v1884_v31 = vld [vmem:[%s2348_s6 + $0xc0] sm:$0xff]  ;;  %v325_v38 = vld [vmem:[#allocation2 + $0x18] sm:$0xff]  ;;  %v452_v44 = vpack.c.bf16 %v332_v37, %v324_v36 }
  0x35   : > { %1175 = vmatpush.bf16.msra.mxu3 %v1889_v11  ;;  %v322_v32 = vld [vmem:[#allocation2] sm:$0xff]  ;;  %v323_v34 = vld [vmem:[#allocation2 + $0x8] sm:$0xff]  ;;  %v333_v39 = vld [vmem:[#allocation2 + $0x58] sm:$0xff]  ;;  %p2124_p13 = pnand %p2123_p12, %p2119_p9 }
  0x36   : > { %1029 = vmatpush.bf16.msra.mxu0 %v1864_v12  ;;  %v330_v33 = vld [vmem:[#allocation2 + $0x40] sm:$0xff]  ;;  %v331_v35 = vld [vmem:[#allocation2 + $0x48] sm:$0xff]  ;;  %v1915_v40 = vld [vmem:[%s2348_s6 + $0x1b8] sm:$0xff]  ;;  %v453_v45 = vpack.c.bf16 %v333_v39, %v325_v38 }
  0x37   : > { %1078 = vmatpush.bf16.msra.mxu1 %v1872_v13  ;;  %v1899_v41 = vld [vmem:[%s2348_s6 + $0x138] sm:$0xff]  ;;  %v450_v42 = vpack.c.bf16 %v330_v33, %v322_v32  ;;  %v451_v43 = vpack.c.bf16 %v331_v35, %v323_v34  ;;  %v1914_v48 = vld [vmem:[%s2348_s6 + $0x1b0] sm:$0xff]  ;;  %v1913_v52 = vld [vmem:[%s2348_s6 + $0x1a8] sm:$0xff] }
  0x38   : > { %1127 = vmatpush.bf16.msra.mxu2 %v1880_v14  ;;  %v1923_v46 = vld [vmem:[%s2348_s6 + $0x1f8] sm:$0xff]  ;;  %v1898_v49 = vld [vmem:[%s2348_s6 + $0x130] sm:$0xff]  ;;  %v1897_v53 = vld [vmem:[%s2348_s6 + $0x128] sm:$0xff] }
  0x39   : > { %1176 = vmatpush.bf16.msra.mxu3 %v1888_v15  ;;  %v1907_v47 = vld [vmem:[%s2348_s6 + $0x178] sm:$0xff]  ;;  %v1922_v50 = vld [vmem:[%s2348_s6 + $0x1f0] sm:$0xff]  ;;  %v1921_v54 = vld [vmem:[%s2348_s6 + $0x1e8] sm:$0xff] }
  0x3a   : > { %1030 = vmatpush.bf16.msra.mxu0 %v1863_v16  ;;  %v1906_v51 = vld [vmem:[%s2348_s6 + $0x170] sm:$0xff]  ;;  %v1905_v55 = vld [vmem:[%s2348_s6 + $0x168] sm:$0xff]  ;;  %v338_v56 = vld [vmem:[#allocation2 + $0x80] sm:$0xff] }
  0x3b   : > { %1079 = vmatpush.bf16.msra.mxu1 %v1871_v17  ;;  %v346_v57 = vld [vmem:[#allocation2 + $0xc0] sm:$0xff]  ;;  %v339_v58 = vld [vmem:[#allocation2 + $0x88] sm:$0xff]  ;;  %v340_v60 = vld [vmem:[#allocation2 + $0x90] sm:$0xff] }
  0x3c   : > { %1128 = vmatpush.bf16.msra.mxu2 %v1879_v18  ;;  %v347_v59 = vld [vmem:[#allocation2 + $0xc8] sm:$0xff]  ;;  %v348_v61 = vld [vmem:[#allocation2 + $0xd0] sm:$0xff]  ;;  %v341_v62 = vld [vmem:[#allocation2 + $0x98] sm:$0xff]  ;;  %v458_v0 = vpack.c.bf16 %v346_v57, %v338_v56 }
  0x3d   : > { %1177 = vmatpush.bf16.msra.mxu3 %v1887_v19  ;;  %v349_v63 = vld [vmem:[#allocation2 + $0xd8] sm:$0xff]  ;;  %v459_v1 = vpack.c.bf16 %v347_v59, %v339_v58  ;;  %v460_v2 = vpack.c.bf16 %v348_v61, %v340_v60  ;;  %v1912_v4 = vld [vmem:[%s2348_s6 + $0x1a0] sm:$0xff]  ;;  %v355_v10 = vld [vmem:[#allocation2 + $0x108] sm:$0xff] }
  0x3e   : > { %1031 = vmatpush.bf16.msra.mxu0 %v1862_v20  ;;  %v461_v3 = vpack.c.bf16 %v349_v63, %v341_v62  ;;  %v1896_v5 = vld [vmem:[%s2348_s6 + $0x120] sm:$0xff]  ;;  %v363_v11 = vld [vmem:[#allocation2 + $0x148] sm:$0xff]  ;;  %v356_v12 = vld [vmem:[#allocation2 + $0x110] sm:$0xff] }
  0x3f   : > { %1080 = vmatpush.bf16.msra.mxu1 %v1870_v21  ;;  %v1920_v6 = vld [vmem:[%s2348_s6 + $0x1e0] sm:$0xff]  ;;  %v364_v13 = vld [vmem:[#allocation2 + $0x150] sm:$0xff]  ;;  %v357_v14 = vld [vmem:[#allocation2 + $0x118] sm:$0xff]  ;;  %v467_v17 = vpack.c.bf16 %v363_v11, %v355_v10 }
  0x40   : > { %1129 = vmatpush.bf16.msra.mxu2 %v1878_v22  ;;  %v1904_v7 = vld [vmem:[%s2348_s6 + $0x160] sm:$0xff]  ;;  %v365_v15 = vld [vmem:[#allocation2 + $0x158] sm:$0xff]  ;;  %v468_v18 = vpack.c.bf16 %v364_v13, %v356_v12  ;;  %v1910_v36 = vld [vmem:[%s2348_s6 + $0x190] sm:$0xff] }
  0x41   : > { %1178 = vmatpush.bf16.msra.mxu3 %v1886_v23  ;;  %v354_v8 = vld [vmem:[#allocation2 + $0x100] sm:$0xff]  ;;  %v469_v19 = vpack.c.bf16 %v365_v15, %v357_v14  ;;  %v1911_v20 = vld [vmem:[%s2348_s6 + $0x198] sm:$0xff]  ;;  %v1894_v37 = vld [vmem:[%s2348_s6 + $0x110] sm:$0xff] }
  0x42   : > { %1032 = vmatpush.bf16.msra.mxu0 %v1861_v24  ;;  %v362_v9 = vld [vmem:[#allocation2 + $0x140] sm:$0xff]  ;;  %v1895_v21 = vld [vmem:[%s2348_s6 + $0x118] sm:$0xff]  ;;  %v1918_v38 = vld [vmem:[%s2348_s6 + $0x1d0] sm:$0xff] }
  0x43   : > { %1081 = vmatpush.bf16.msra.mxu1 %v1869_v25  ;;  %v466_v16 = vpack.c.bf16 %v362_v9, %v354_v8  ;;  %v1919_v22 = vld [vmem:[%s2348_s6 + $0x1d8] sm:$0xff]  ;;  %v370_v24 = vld [vmem:[#allocation2 + $0x180] sm:$0xff]  ;;  %v1902_v39 = vld [vmem:[%s2348_s6 + $0x150] sm:$0xff] }
  0x44   : > { %1130 = vmatpush.bf16.msra.mxu2 %v1877_v26  ;;  %v1903_v23 = vld [vmem:[%s2348_s6 + $0x158] sm:$0xff]  ;;  %v378_v25 = vld [vmem:[#allocation2 + $0x1c0] sm:$0xff]  ;;  %v371_v26 = vld [vmem:[#allocation2 + $0x188] sm:$0xff] }
  0x45   : > { %1179 = vmatpush.bf16.msra.mxu3 %v1885_v27  ;;  %v379_v27 = vld [vmem:[#allocation2 + $0x1c8] sm:$0xff]  ;;  %v474_v32 = vpack.c.bf16 %v378_v25, %v370_v24  ;;  %v402_v56 = vld [vmem:[#allocation2 + $0x280] sm:$0xff]  ;;  %v404_v60 = vld [vmem:[#allocation2 + $0x290] sm:$0xff] }
  0x46   : > { %1033 = vmatpush.bf16.msra.mxu0 %v1860_v28  ;;  %v372_v28 = vld [vmem:[#allocation2 + $0x190] sm:$0xff]  ;;  %v475_v33 = vpack.c.bf16 %v379_v27, %v371_v26  ;;  %v410_v57 = vld [vmem:[#allocation2 + $0x2c0] sm:$0xff]  ;;  %v403_v58 = vld [vmem:[#allocation2 + $0x288] sm:$0xff] }
  0x47   : > { %1082 = vmatpush.bf16.msra.mxu1 %v1868_v29  ;;  %v380_v29 = vld [vmem:[#allocation2 + $0x1d0] sm:$0xff]  ;;  %v411_v59 = vld [vmem:[#allocation2 + $0x2c8] sm:$0xff]  ;;  %v405_v62 = vld [vmem:[#allocation2 + $0x298] sm:$0xff] }
  0x48   : > { %1131 = vmatpush.bf16.msra.mxu2 %v1876_v30  ;;  %v373_v30 = vld [vmem:[#allocation2 + $0x198] sm:$0xff]  ;;  %v476_v34 = vpack.c.bf16 %v380_v29, %v372_v28  ;;  %v412_v61 = vld [vmem:[#allocation2 + $0x2d0] sm:$0xff]  ;;  %v418_v8 = vld [vmem:[#allocation2 + $0x300] sm:$0xff] }
  0x49   : > { %1180 = vmatpush.bf16.msra.mxu3 %v1884_v31  ;;  %1034 = vmatmul.bf16.vlgmr.msra.gmra.mxu0 %v450_v42  ;;  %v381_v31 = vld [vmem:[#allocation2 + $0x1d8] sm:$0xff]  ;;  %v387_v42 = vld [vmem:[#allocation2 + $0x208] sm:$0xff]  ;;  %v426_v9 = vld [vmem:[#allocation2 + $0x340] sm:$0xff] }
  0x4a   : > { %1222 = vmatpush.bf16.msrb.mxu0 %v1899_v41  ;;  %1083 = vmatmul.bf16.vlgmr.msra.gmra.mxu1 %v451_v43  ;;  %v477_v35 = vpack.c.bf16 %v381_v31, %v373_v30  ;;  %v394_v41 = vld [vmem:[#allocation2 + $0x240] sm:$0xff]  ;;  %v395_v43 = vld [vmem:[#allocation2 + $0x248] sm:$0xff]  ;;  %v413_v63 = vld [vmem:[#allocation2 + $0x2d8] sm:$0xff] }
  0x4b   : > { %1132 = vmatmul.bf16.vlgmr.msra.gmra.mxu2 %v452_v44  ;;  %1271 = vmatpush.bf16.msrb.mxu1 %v1907_v47  ;;  %v388_v44 = vld [vmem:[#allocation2 + $0x210] sm:$0xff]  ;;  %v397_v47 = vld [vmem:[#allocation2 + $0x258] sm:$0xff]  ;;  %v419_v10 = vld [vmem:[#allocation2 + $0x308] sm:$0xff] }
  0x4c   : > { %1320 = vmatpush.bf16.msrb.mxu2 %v1915_v40  ;;  %1181 = vmatmul.bf16.vlgmr.msra.gmra.mxu3 %v453_v45  ;;  %v386_v40 = vld [vmem:[#allocation2 + $0x200] sm:$0xff]  ;;  %v396_v45 = vld [vmem:[#allocation2 + $0x250] sm:$0xff]  ;;  %v427_v11 = vld [vmem:[#allocation2 + $0x348] sm:$0xff] }
  0x4d   : > { %1369 = vmatpush.bf16.msrb.mxu3 %v1923_v46  ;;  %v389_v46 = vld [vmem:[#allocation2 + $0x218] sm:$0xff]  ;;  %v420_v12 = vld [vmem:[#allocation2 + $0x310] sm:$0xff] }
  0x4e   : > { %1223 = vmatpush.bf16.msrb.mxu0 %v1898_v49  ;;  %v483_v49 = vpack.c.bf16 %v395_v43, %v387_v42  ;;  %v428_v13 = vld [vmem:[#allocation2 + $0x350] sm:$0xff]  ;;  %v421_v14 = vld [vmem:[#allocation2 + $0x318] sm:$0xff] }
  0x4f   : > { %1272 = vmatpush.bf16.msrb.mxu1 %v1906_v51  ;;  %v485_v51 = vpack.c.bf16 %v397_v47, %v389_v46  ;;  %v429_v15 = vld [vmem:[#allocation2 + $0x358] sm:$0xff]  ;;  %v436_v24 = vld [vmem:[#allocation2 + $0x390] sm:$0xff] }
  0x50   : > { %1321 = vmatpush.bf16.msrb.mxu2 %v1914_v48  ;;  %v482_v48 = vpack.c.bf16 %v394_v41, %v386_v40  ;;  %v444_v25 = vld [vmem:[#allocation2 + $0x3d0] sm:$0xff]  ;;  %v437_v26 = vld [vmem:[#allocation2 + $0x398] sm:$0xff] }
  0x51   : > { %1370 = vmatpush.bf16.msrb.mxu3 %v1922_v50  ;;  %v484_v50 = vpack.c.bf16 %v396_v45, %v388_v44  ;;  %v445_v27 = vld [vmem:[#allocation2 + $0x3d8] sm:$0xff]  ;;  %v508_v30 = vpack.c.bf16 %v444_v25, %v436_v24 }
  0x52   : > { %1224 = vmatpush.bf16.msrb.mxu0 %v1897_v53  ;;  %v1893_v53 = vld [vmem:[%s2348_s6 + $0x108] sm:$0xff]  ;;  %v509_v31 = vpack.c.bf16 %v445_v27, %v437_v26 }
  0x53   : > { %1273 = vmatpush.bf16.msrb.mxu1 %v1905_v55  ;;  %v1901_v55 = vld [vmem:[%s2348_s6 + $0x148] sm:$0xff] }
  0x54   : > { %1322 = vmatpush.bf16.msrb.mxu2 %v1913_v52  ;;  %v1909_v52 = vld [vmem:[%s2348_s6 + $0x188] sm:$0xff] }
  0x55   : > { %1371 = vmatpush.bf16.msrb.mxu3 %v1921_v54  ;;  %v1917_v54 = vld [vmem:[%s2348_s6 + $0x1c8] sm:$0xff] }
  0x56   : > { %1225 = vmatpush.bf16.msrb.mxu0 %v1896_v5  ;;  %v1892_v5 = vld [vmem:[%s2348_s6 + $0x100] sm:$0xff] }
  0x57   : > { %1274 = vmatpush.bf16.msrb.mxu1 %v1904_v7  ;;  %v1900_v7 = vld [vmem:[%s2348_s6 + $0x140] sm:$0xff] }
  0x58   : > { %1323 = vmatpush.bf16.msrb.mxu2 %v1912_v4  ;;  %v1908_v4 = vld [vmem:[%s2348_s6 + $0x180] sm:$0xff] }
  0x59   : > { %1039 = vmatmul.bf16.gmra.mxu0 %v458_v0  ;;  %1372 = vmatpush.bf16.msrb.mxu3 %v1920_v6  ;;  %v490_v0 = vpack.c.bf16 %v410_v57, %v402_v56  ;;  %v1916_v6 = vld [vmem:[%s2348_s6 + $0x1c0] sm:$0xff]  ;;  %v343_v56 = vld [vmem:[#allocation2 + $0xa8] sm:$0xff] }
  0x5a   : > { %1088 = vmatmul.bf16.gmra.mxu1 %v459_v1  ;;  %1226 = vmatpush.bf16.msrb.mxu0 %v1895_v21  ;;  %v491_v1 = vpack.c.bf16 %v411_v59, %v403_v58  ;;  %v442_v21 = vld [vmem:[#allocation2 + $0x3c0] sm:$0xff]  ;;  %v351_v57 = vld [vmem:[#allocation2 + $0xe8] sm:$0xff]  ;;  %v344_v58 = vld [vmem:[#allocation2 + $0xb0] sm:$0xff] }
  0x5b   : > { %1137 = vmatmul.bf16.gmra.mxu2 %v460_v2  ;;  %1275 = vmatpush.bf16.msrb.mxu1 %v1903_v23  ;;  %v492_v2 = vpack.c.bf16 %v412_v61, %v404_v60  ;;  %v443_v23 = vld [vmem:[#allocation2 + $0x3c8] sm:$0xff]  ;;  %v352_v59 = vld [vmem:[#allocation2 + $0xf0] sm:$0xff]  ;;  %v345_v60 = vld [vmem:[#allocation2 + $0xb8] sm:$0xff] }
  0x5c   : > { %1186 = vmatmul.bf16.gmra.mxu3 %v461_v3  ;;  %1324 = vmatpush.bf16.msrb.mxu2 %v1911_v20  ;;  %v493_v3 = vpack.c.bf16 %v413_v63, %v405_v62  ;;  %v434_v20 = vld [vmem:[#allocation2 + $0x380] sm:$0xff]  ;;  %v353_v61 = vld [vmem:[#allocation2 + $0xf8] sm:$0xff] }
  0x5d   : > { %1373 = vmatpush.bf16.msrb.mxu3 %v1919_v22  ;;  %v435_v22 = vld [vmem:[#allocation2 + $0x388] sm:$0xff]  ;;  %v506_v28 = vpack.c.bf16 %v442_v21, %v434_v20  ;;  %v360_v20 = vld [vmem:[#allocation2 + $0x130] sm:$0xff] }
  0x5e   : > { %1227 = vmatpush.bf16.msrb.mxu0 %v1894_v37  ;;  %v507_v29 = vpack.c.bf16 %v443_v23, %v435_v22  ;;  %v336_v37 = vld [vmem:[#allocation2 + $0x70] sm:$0xff]  ;;  %v361_v22 = vld [vmem:[#allocation2 + $0x138] sm:$0xff] }
  0x5f   : > { %1276 = vmatpush.bf16.msrb.mxu1 %v1902_v39  ;;  %v337_v39 = vld [vmem:[#allocation2 + $0x78] sm:$0xff]  ;;  %v368_v21 = vld [vmem:[#allocation2 + $0x170] sm:$0xff] }
  0x60   : > { %1325 = vmatpush.bf16.msrb.mxu2 %v1910_v36  ;;  %v328_v36 = vld [vmem:[#allocation2 + $0x30] sm:$0xff]  ;;  %v369_v23 = vld [vmem:[#allocation2 + $0x178] sm:$0xff] }
  0x61   : > { %1374 = vmatpush.bf16.msrb.mxu3 %v1918_v38  ;;  %v329_v38 = vld [vmem:[#allocation2 + $0x38] sm:$0xff]  ;;  %v456_v44 = vpack.c.bf16 %v336_v37, %v328_v36 }
  0x62   : > { %1228 = vmatpush.bf16.msrb.mxu0 %v1893_v53  ;;  %v457_v45 = vpack.c.bf16 %v337_v39, %v329_v38 }
  0x63   : > { %1277 = vmatpush.bf16.msrb.mxu1 %v1901_v55  ;;  %v350_v55 = vld [vmem:[#allocation2 + $0xe0] sm:$0xff] }
  0x64   : > { %1326 = vmatpush.bf16.msrb.mxu2 %v1909_v52 }
  0x65   : > { %1375 = vmatpush.bf16.msrb.mxu3 %v1917_v54  ;;  %v342_v54 = vld [vmem:[#allocation2 + $0xa0] sm:$0xff] }
  0x66   : > { %1229 = vmatpush.bf16.msrb.mxu0 %v1892_v5  ;;  %v464_v5 = vpack.c.bf16 %v352_v59, %v344_v58 }
  0x67   : > { %1278 = vmatpush.bf16.msrb.mxu1 %v1900_v7 }
  0x68   : > { %1327 = vmatpush.bf16.msrb.mxu2 %v1908_v4 }
  0x69   : > { %1044 = vmatmul.bf16.gmra.mxu0 %v466_v16  ;;  %1376 = vmatpush.bf16.msrb.mxu3 %v1916_v6  ;;  %v498_v16 = vpack.c.bf16 %v426_v9, %v418_v8  ;;  %v465_v6 = vpack.c.bf16 %v353_v61, %v345_v60 }
  0x6a   : > { %1093 = vmatmul.bf16.gmra.mxu1 %v467_v17  ;;  %v499_v17 = vpack.c.bf16 %v427_v11, %v419_v10 }
  0x6b   : > { %1142 = vmatmul.bf16.gmra.mxu2 %v468_v18  ;;  %v500_v18 = vpack.c.bf16 %v428_v13, %v420_v12 }
  0x6c   : > { %1191 = vmatmul.bf16.gmra.mxu3 %v469_v19  ;;  %v501_v19 = vpack.c.bf16 %v429_v15, %v421_v14 }
  0x79   : > { %1049 = vmatmul.bf16.gmra.mxu0 %v474_v32  ;;  %v326_v32 = vld [vmem:[#allocation2 + $0x20] sm:$0xff] }
  0x7a   : > { %1098 = vmatmul.bf16.gmra.mxu1 %v475_v33  ;;  %v334_v33 = vld [vmem:[#allocation2 + $0x60] sm:$0xff] }
  0x7b   : > { %1147 = vmatmul.bf16.gmra.mxu2 %v476_v34  ;;  %v327_v34 = vld [vmem:[#allocation2 + $0x28] sm:$0xff]  ;;  %v454_v40 = vpack.c.bf16 %v334_v33, %v326_v32  ;;  %v473_v32 = vpack.c.bf16 %v369_v23, %v361_v22 }
  0x7c   : > { %1196 = vmatmul.bf16.gmra.mxu3 %v477_v35  ;;  %v335_v35 = vld [vmem:[#allocation2 + $0x68] sm:$0xff] }
  0x7d   : > { %v455_v41 = vpack.c.bf16 %v335_v35, %v327_v34 }
  0x89   : > { %1054 = vmatmul.bf16.gmra.mxu0 %v482_v48 }
  0x8a   : > { %1103 = vmatmul.bf16.gmra.mxu1 %v483_v49 }
  0x8b   : > { %1152 = vmatmul.bf16.gmra.mxu2 %v484_v50 }
  0x8c   : > { %1201 = vmatmul.bf16.gmra.mxu3 %v485_v51 }
  0x99   : > { %1059 = vmatmul.bf16.gmra.mxu0 %v490_v0  ;;  %v462_v0 = vpack.c.bf16 %v350_v55, %v342_v54 }
  0x9a   : > { %1108 = vmatmul.bf16.gmra.mxu1 %v491_v1  ;;  %v463_v1 = vpack.c.bf16 %v351_v57, %v343_v56 }
  0x9b   : > { %1157 = vmatmul.bf16.gmra.mxu2 %v492_v2 }
  0x9c   : > { %1206 = vmatmul.bf16.gmra.mxu3 %v493_v3 }
  0xa9   : > { %1064 = vmatmul.bf16.gmra.mxu0 %v498_v16  ;;  %v358_v16 = vld [vmem:[#allocation2 + $0x120] sm:$0xff] }
  0xaa   : > { %1113 = vmatmul.bf16.gmra.mxu1 %v499_v17  ;;  %v366_v17 = vld [vmem:[#allocation2 + $0x160] sm:$0xff] }
  0xab   : > { %1162 = vmatmul.bf16.gmra.mxu2 %v500_v18  ;;  %v359_v18 = vld [vmem:[#allocation2 + $0x128] sm:$0xff]  ;;  %v470_v26 = vpack.c.bf16 %v366_v17, %v358_v16 }
  0xac   : > { %1211 = vmatmul.bf16.gmra.mxu3 %v501_v19  ;;  %v367_v19 = vld [vmem:[#allocation2 + $0x168] sm:$0xff] }
  0xad   : > { %v471_v27 = vpack.c.bf16 %v367_v19, %v359_v18 }
  0xb9   : > { %1069 = vmatmul.bf16.gmra.mxu0 %v506_v28 }
  0xba   : > { %1118 = vmatmul.bf16.gmra.mxu1 %v507_v29 }
  0xbb   : > { %1167 = vmatmul.bf16.gmra.mxu2 %v508_v30 }
  0xbc   : > { %1216 = vmatmul.bf16.gmra.mxu3 %v509_v31  ;;  %v472_v31 = vpack.c.bf16 %v368_v21, %v360_v20 }
  0xc6   : > { %v1035_v42 = vpop.f32.mrf.mxu0 }
  0xc7   : > { %v1084_v43 = vpop.f32.mrf.mxu1 }
  0xc8   : > { %v1085_v46 = vadd.f32 %v1084_v43, %v1035_v42  ;;  %v374_v42 = vld [vmem:[#allocation2 + $0x1a0] sm:$0xff] }
  0xc9   : > { %1230 = vmatmul.bf16.vlgmr.msrb.gmra.mxu0 %v454_v40  ;;  %v382_v43 = vld [vmem:[#allocation2 + $0x1e0] sm:$0xff] }
  0xca   : > { %1279 = vmatmul.bf16.vlgmr.msrb.gmra.mxu1 %v455_v41 }
  0xcb   : > { %1328 = vmatmul.bf16.vlgmr.msrb.gmra.mxu2 %v456_v44  ;;  %v375_v44 = vld [vmem:[#allocation2 + $0x1a8] sm:$0xff] }
  0xcc   : > { %1377 = vmatmul.bf16.vlgmr.msrb.gmra.mxu3 %v457_v45  ;;  %v383_v45 = vld [vmem:[#allocation2 + $0x1e8] sm:$0xff] }
  0xcd   : > { %v479_v54 = vpack.c.bf16 %v383_v45, %v375_v44 }
  0xce   : > { %v1133_v47 = vpop.f32.mrf.mxu2  ;;  %v1037_v50 = vpop.f32.mrf.mxu0 }
  0xcf   : > { %v1182_v48 = vpop.f32.mrf.mxu3  ;;  %v1134_v49 = vadd.f32 %v1133_v47, %v1085_v46  ;;  %v1086_v51 = vpop.f32.mrf.mxu1  ;;  %v376_v46 = vld [vmem:[#allocation2 + $0x1b0] sm:$0xff] }
  0xd0   : > { %v1087_v52 = vadd.f32 %v1086_v51, %v1037_v50  ;;  %v384_v47 = vld [vmem:[#allocation2 + $0x1f0] sm:$0xff] }
  0xd1   : > { %v2419_v53 = vadd.f32 %v1182_v48, %v1134_v49  ;;  %v377_v48 = vld [vmem:[#allocation2 + $0x1b8] sm:$0xff]  ;;  %v480_v58 = vpack.c.bf16 %v384_v47, %v376_v46 }
  0xd2   : > { %v385_v49 = vld [vmem:[#allocation2 + $0x1f8] sm:$0xff] }
  0xd3   : > { %v481_v59 = vpack.c.bf16 %v385_v49, %v377_v48 }
  0xd6   : > { %v1135_v62 = vpop.f32.mrf.mxu2  ;;  %v1040_v3 = vpop.f32.mrf.mxu0 }
  0xd7   : > { %v1184_v63 = vpop.f32.mrf.mxu3  ;;  %v1136_v2 = vadd.f32 %v1135_v62, %v1087_v52  ;;  %v1089_v4 = vpop.f32.mrf.mxu1  ;;  %v478_v52 = vpack.c.bf16 %v382_v43, %v374_v42  ;;  %v417_v42 = vld [vmem:[#allocation2 + $0x2f8] sm:$0xff] }
  0xd8   : > { %v1090_v7 = vadd.f32 %v1089_v4, %v1040_v3 }
  0xd9   : > { %v2421_v8 = vadd.f32 %v1184_v63, %v1136_v2  ;;  %1235 = vmatmul.bf16.gmra.mxu0 %v462_v0 }
  0xda   : > { %1284 = vmatmul.bf16.gmra.mxu1 %v463_v1 }
  0xdb   : > { %1333 = vmatmul.bf16.gmra.mxu2 %v464_v5  ;;  %v390_v5 = vld [vmem:[#allocation2 + $0x220] sm:$0xff] }
  0xdc   : > { %1382 = vmatmul.bf16.gmra.mxu3 %v465_v6  ;;  %v398_v6 = vld [vmem:[#allocation2 + $0x260] sm:$0xff] }
  0xdd   : > { %v486_v17 = vpack.c.bf16 %v398_v6, %v390_v5  ;;  %v432_v5 = vld [vmem:[#allocation2 + $0x370] sm:$0xff]  ;;  %v425_v6 = vld [vmem:[#allocation2 + $0x338] sm:$0xff] }
  0xde   : > { %v1138_v9 = vpop.f32.mrf.mxu2  ;;  %v1042_v12 = vpop.f32.mrf.mxu0 }
  0xdf   : > { %v1187_v10 = vpop.f32.mrf.mxu3  ;;  %v1139_v11 = vadd.f32 %v1138_v9, %v1090_v7  ;;  %v1091_v13 = vpop.f32.mrf.mxu1  ;;  %v391_v7 = vld [vmem:[#allocation2 + $0x228] sm:$0xff] }
  0xe0   : > { %v1092_v14 = vadd.f32 %v1091_v13, %v1042_v12  ;;  %v399_v9 = vld [vmem:[#allocation2 + $0x268] sm:$0xff]  ;;  %v393_v12 = vld [vmem:[#allocation2 + $0x238] sm:$0xff] }
  0xe1   : > { %v2423_v15 = vadd.f32 %v1187_v10, %v1139_v11  ;;  %v392_v10 = vld [vmem:[#allocation2 + $0x230] sm:$0xff]  ;;  %v401_v13 = vld [vmem:[#allocation2 + $0x278] sm:$0xff]  ;;  %v487_v18 = vpack.c.bf16 %v399_v9, %v391_v7 }
  0xe2   : > { %v400_v11 = vld [vmem:[#allocation2 + $0x270] sm:$0xff]  ;;  %v489_v23 = vpack.c.bf16 %v401_v13, %v393_v12  ;;  %v433_v7 = vld [vmem:[#allocation2 + $0x378] sm:$0xff] }
  0xe3   : > { %v488_v22 = vpack.c.bf16 %v400_v11, %v392_v10 }
  0xe6   : > { %v1140_v24 = vpop.f32.mrf.mxu2  ;;  %v1045_v29 = vpop.f32.mrf.mxu0 }
  0xe7   : > { %v1189_v25 = vpop.f32.mrf.mxu3  ;;  %v1141_v28 = vadd.f32 %v1140_v24, %v1092_v14  ;;  %v1094_v30 = vpop.f32.mrf.mxu1 }
  0xe8   : > { %v1095_v33 = vadd.f32 %v1094_v30, %v1045_v29 }
  0xe9   : > { %v2425_v34 = vadd.f32 %v1189_v25, %v1141_v28  ;;  %1240 = vmatmul.bf16.gmra.mxu0 %v470_v26 }
  0xea   : > { %1289 = vmatmul.bf16.gmra.mxu1 %v471_v27 }
  0xeb   : > { %1338 = vmatmul.bf16.gmra.mxu2 %v472_v31 }
  0xec   : > { %1387 = vmatmul.bf16.gmra.mxu3 %v473_v32 }
  0xee   : > { %v1143_v35 = vpop.f32.mrf.mxu2  ;;  %v1047_v38 = vpop.f32.mrf.mxu0 }
  0xef   : > { %v1192_v36 = vpop.f32.mrf.mxu3  ;;  %v1144_v37 = vadd.f32 %v1143_v35, %v1095_v33  ;;  %v1096_v39 = vpop.f32.mrf.mxu1  ;;  %v406_v33 = vld [vmem:[#allocation2 + $0x2a0] sm:$0xff] }
  0xf0   : > { %v1097_v40 = vadd.f32 %v1096_v39, %v1047_v38  ;;  %v414_v35 = vld [vmem:[#allocation2 + $0x2e0] sm:$0xff]  ;;  %v408_v38 = vld [vmem:[#allocation2 + $0x2b0] sm:$0xff] }
  0xf1   : > { %v2427_v41 = vadd.f32 %v1192_v36, %v1144_v37  ;;  %v407_v36 = vld [vmem:[#allocation2 + $0x2a8] sm:$0xff]  ;;  %v416_v39 = vld [vmem:[#allocation2 + $0x2f0] sm:$0xff]  ;;  %v494_v45 = vpack.c.bf16 %v414_v35, %v406_v33 }
  0xf2   : > { %v415_v37 = vld [vmem:[#allocation2 + $0x2e8] sm:$0xff]  ;;  %v440_v35 = vld [vmem:[#allocation2 + $0x3b0] sm:$0xff] }
  0xf3   : > { %v495_v46 = vpack.c.bf16 %v415_v37, %v407_v36  ;;  %v447_v33 = vld [vmem:[#allocation2 + $0x3e8] sm:$0xff]  ;;  %v448_v36 = vld [vmem:[#allocation2 + $0x3f0] sm:$0xff]  ;;  %v441_v37 = vld [vmem:[#allocation2 + $0x3b8] sm:$0xff] }
  0xf6   : > { %v1145_v50 = vpop.f32.mrf.mxu2  ;;  %v1050_v56 = vpop.f32.mrf.mxu0 }
  0xf7   : > { %v1194_v51 = vpop.f32.mrf.mxu3  ;;  %v1146_v55 = vadd.f32 %v1145_v50, %v1097_v40  ;;  %v1099_v57 = vpop.f32.mrf.mxu1  ;;  %v409_v40 = vld [vmem:[#allocation2 + $0x2b8] sm:$0xff]  ;;  %v496_v50 = vpack.c.bf16 %v416_v39, %v408_v38 }
  0xf8   : > { %v1100_v60 = vadd.f32 %v1099_v57, %v1050_v56  ;;  %v449_v38 = vld [vmem:[#allocation2 + $0x3f8] sm:$0xff] }
  0xf9   : > { %v2429_v61 = vadd.f32 %v1194_v51, %v1146_v55  ;;  %1245 = vmatmul.bf16.gmra.mxu0 %v478_v52  ;;  %v497_v51 = vpack.c.bf16 %v417_v42, %v409_v40 }
  0xfa   : > { %1294 = vmatmul.bf16.gmra.mxu1 %v479_v54 }
  0xfb   : > { %1343 = vmatmul.bf16.gmra.mxu2 %v480_v58 }
  0xfc   : > { %1392 = vmatmul.bf16.gmra.mxu3 %v481_v59 }
  0xfe   : > { %v1148_v62 = vpop.f32.mrf.mxu2  ;;  %v1052_v1 = vpop.f32.mrf.mxu0 }
  0xff   : > { %v1197_v63 = vpop.f32.mrf.mxu3  ;;  %v1149_v0 = vadd.f32 %v1148_v62, %v1100_v60  ;;  %v1101_v2 = vpop.f32.mrf.mxu1 }
 0x100   : > { %v1102_v3 = vadd.f32 %v1101_v2, %v1052_v1  ;;  %v423_v1 = vld [vmem:[#allocation2 + $0x328] sm:$0xff] }
 0x101   : > { %v2431_v4 = vadd.f32 %v1197_v63, %v1149_v0  ;;  %v422_v63 = vld [vmem:[#allocation2 + $0x320] sm:$0xff]  ;;  %v431_v2 = vld [vmem:[#allocation2 + $0x368] sm:$0xff] }
 0x102   : > { %v430_v0 = vld [vmem:[#allocation2 + $0x360] sm:$0xff]  ;;  %v503_v12 = vpack.c.bf16 %v431_v2, %v423_v1 }
 0x103   : > { %v502_v11 = vpack.c.bf16 %v430_v0, %v422_v63 }
 0x106   : > { %v1150_v14 = vpop.f32.mrf.mxu2  ;;  %v1055_v20 = vpop.f32.mrf.mxu0 }
 0x107   : > { %v1199_v16 = vpop.f32.mrf.mxu3  ;;  %v1151_v19 = vadd.f32 %v1150_v14, %v1102_v3  ;;  %v1104_v21 = vpop.f32.mrf.mxu1  ;;  %v424_v3 = vld [vmem:[#allocation2 + $0x330] sm:$0xff] }
 0x108   : > { %v1105_v24 = vadd.f32 %v1104_v21, %v1055_v20 }
 0x109   : > { %v2433_v25 = vadd.f32 %v1199_v16, %v1151_v19  ;;  %1250 = vmatmul.bf16.gmra.mxu0 %v486_v17  ;;  %v504_v17 = vpack.c.bf16 %v432_v5, %v424_v3 }
 0x10a   : > { %1299 = vmatmul.bf16.gmra.mxu1 %v487_v18  ;;  %v505_v18 = vpack.c.bf16 %v433_v7, %v425_v6 }
 0x10b   : > { %1348 = vmatmul.bf16.gmra.mxu2 %v488_v22 }
 0x10c   : > { %1397 = vmatmul.bf16.gmra.mxu3 %v489_v23 }
 0x10e   : > { %v1153_v26 = vpop.f32.mrf.mxu2  ;;  %v1057_v29 = vpop.f32.mrf.mxu0 }
 0x10f   : > { %v1202_v27 = vpop.f32.mrf.mxu3  ;;  %v1154_v28 = vadd.f32 %v1153_v26, %v1105_v24  ;;  %v1106_v30 = vpop.f32.mrf.mxu1 }
 0x110   : > { %v1107_v31 = vadd.f32 %v1106_v30, %v1057_v29  ;;  %v438_v29 = vld [vmem:[#allocation2 + $0x3a0] sm:$0xff] }
 0x111   : > { %v2435_v32 = vadd.f32 %v1202_v27, %v1154_v28  ;;  %v446_v30 = vld [vmem:[#allocation2 + $0x3e0] sm:$0xff] }
 0x112   : > { %v510_v42 = vpack.c.bf16 %v446_v30, %v438_v29 }
 0x116   : > { %v1155_v43 = vpop.f32.mrf.mxu2  ;;  %v1060_v48 = vpop.f32.mrf.mxu0 }
 0x117   : > { %v1204_v44 = vpop.f32.mrf.mxu3  ;;  %v1156_v47 = vadd.f32 %v1155_v43, %v1107_v31  ;;  %v1109_v49 = vpop.f32.mrf.mxu1  ;;  %v439_v31 = vld [vmem:[#allocation2 + $0x3a8] sm:$0xff] }
 0x118   : > { %v1110_v52 = vadd.f32 %v1109_v49, %v1060_v48  ;;  %v511_v43 = vpack.c.bf16 %v447_v33, %v439_v31  ;;  %v513_v48 = vpack.c.bf16 %v449_v38, %v441_v37 }
 0x119   : > { %v2437_v54 = vadd.f32 %v1204_v44, %v1156_v47  ;;  %1255 = vmatmul.bf16.gmra.mxu0 %v494_v45  ;;  %v512_v47 = vpack.c.bf16 %v448_v36, %v440_v35 }
 0x11a   : > { %1304 = vmatmul.bf16.gmra.mxu1 %v495_v46 }
 0x11b   : > { %1353 = vmatmul.bf16.gmra.mxu2 %v496_v50 }
 0x11c   : > { %1402 = vmatmul.bf16.gmra.mxu3 %v497_v51 }
 0x11e   : > { %v1158_v55 = vpop.f32.mrf.mxu2  ;;  %v1062_v58 = vpop.f32.mrf.mxu0 }
 0x11f   : > { %v1207_v56 = vpop.f32.mrf.mxu3  ;;  %v1159_v57 = vadd.f32 %v1158_v55, %v1110_v52  ;;  %v1111_v59 = vpop.f32.mrf.mxu1 }
 0x120   : > { %v1112_v60 = vadd.f32 %v1111_v59, %v1062_v58 }
 0x121   : > { %v2439_v62 = vadd.f32 %v1207_v56, %v1159_v57 }
 0x126   : > { %v1160_v9 = vpop.f32.mrf.mxu2  ;;  %v1065_v14 = vpop.f32.mrf.mxu0 }
 0x127   : > { %v1209_v10 = vpop.f32.mrf.mxu3  ;;  %v1161_v13 = vadd.f32 %v1160_v9, %v1112_v60  ;;  %v1114_v16 = vpop.f32.mrf.mxu1 }
 0x128   : > { %v1115_v19 = vadd.f32 %v1114_v16, %v1065_v14 }
 0x129   : > { %v2441_v20 = vadd.f32 %v1209_v10, %v1161_v13  ;;  %1260 = vmatmul.bf16.gmra.mxu0 %v502_v11  ;;  %v2455_v11 = vld [vmem:[%s250_s7] ss:$0 sm:$0xff] }
 0x12a   : > { %1309 = vmatmul.bf16.gmra.mxu1 %v503_v12 }
 0x12b   : > { %1358 = vmatmul.bf16.gmra.mxu2 %v504_v17 }
 0x12c   : > { %1407 = vmatmul.bf16.gmra.mxu3 %v505_v18 }
 0x12e   : > { %v1163_v21 = vpop.f32.mrf.mxu2  ;;  %v1067_v24 = vpop.f32.mrf.mxu0 }
 0x12f   : > { %v1212_v22 = vpop.f32.mrf.mxu3  ;;  %v1164_v23 = vadd.f32 %v1163_v21, %v1115_v19  ;;  %v1116_v26 = vpop.f32.mrf.mxu1 }
 0x130   : > { %v1117_v27 = vadd.f32 %v1116_v26, %v1067_v24 }
 0x131   : > { %v2443_v28 = vadd.f32 %v1212_v22, %v1164_v23 }
 0x136   : > { %v1165_v39 = vpop.f32.mrf.mxu2  ;;  %v1070_v45 = vpop.f32.mrf.mxu0 }
 0x137   : > { %v1214_v40 = vpop.f32.mrf.mxu3  ;;  %v1166_v44 = vadd.f32 %v1165_v39, %v1117_v27  ;;  %v1119_v46 = vpop.f32.mrf.mxu1 }
 0x138   : > { %v1120_v49 = vadd.f32 %v1119_v46, %v1070_v45 }
 0x139   : > { %v2445_v50 = vadd.f32 %v1214_v40, %v1166_v44  ;;  %1265 = vmatmul.bf16.gmra.mxu0 %v510_v42 }
 0x13a   : > { %1314 = vmatmul.bf16.gmra.mxu1 %v511_v43 }
 0x13b   : > { %1363 = vmatmul.bf16.gmra.mxu2 %v512_v47 }
 0x13c   : > { %1412 = vmatmul.bf16.gmra.mxu3 %v513_v48 }
 0x13e   : > { %v1168_v51 = vpop.f32.mrf.mxu2  ;;  %v1072_v56 = vpop.f32.mrf.mxu0 }
 0x13f   : > { %v1217_v52 = vpop.f32.mrf.mxu3  ;;  %v1169_v55 = vadd.f32 %v1168_v51, %v1120_v49  ;;  %v1121_v57 = vpop.f32.mrf.mxu1 }
 0x140   : > { %v1122_v58 = vadd.f32 %v1121_v57, %v1072_v56 }
 0x141   : > { %v2447_v59 = vadd.f32 %v1217_v52, %v1169_v55 }
 0x146   : > { %v1170_v60 = vpop.f32.mrf.mxu2  ;;  %v1231_v1 = vpop.f32.mrf.mxu0 }
 0x147   : > { %v1219_v63 = vpop.f32.mrf.mxu3  ;;  %v1171_v0 = vadd.f32 %v1170_v60, %v1122_v58  ;;  %v1280_v2 = vpop.f32.mrf.mxu1  ;;  %v1232_v5 = vadd.f32 %v1231_v1, %v2419_v53 }
 0x149   : > { %v2449_v3 = vadd.f32 %v1219_v63, %v1171_v0  ;;  %v1281_v6 = vadd.f32 %v1280_v2, %v1232_v5 }
 0x14e   : > { %v1329_v7 = vpop.f32.mrf.mxu2  ;;  %v1233_v12 = vpop.f32.mrf.mxu0 }
 0x14f   : > { %v1378_v9 = vpop.f32.mrf.mxu3  ;;  %v1330_v10 = vadd.f32 %v1329_v7, %v1281_v6  ;;  %v1282_v13 = vpop.f32.mrf.mxu1  ;;  %v1234_v16 = vadd.f32 %v1233_v12, %v2421_v8 }
 0x151   : > { %v1379_v14 = vadd.f32 %v1378_v9, %v1330_v10  ;;  %v1283_v53 = vadd.f32 %v1282_v13, %v1234_v16 }
 0x153   : > { %v1418_v17 = vadd.f32 %v2455_v11, %v1379_v14 }
 0x155   : > { %1434 = vst [vmem:[%s2459_s20] sm:$0xff] %v1418_v17 }
 0x156   : > { %v1331_v18 = vpop.f32.mrf.mxu2  ;;  %v1236_v22 = vpop.f32.mrf.mxu0 }
 0x157   : > { %v1380_v19 = vpop.f32.mrf.mxu3  ;;  %v1332_v21 = vadd.f32 %v1331_v18, %v1283_v53  ;;  %v1285_v23 = vpop.f32.mrf.mxu1  ;;  %v1237_v26 = vadd.f32 %v1236_v22, %v2423_v15 }
 0x159   : > { %v1381_v24 = vadd.f32 %v1380_v19, %v1332_v21  ;;  %v1286_v8 = vadd.f32 %v1285_v23, %v1237_v26 }
 0x15b   : > { %v1419_v27 = vadd.f32 %v2455_v11, %v1381_v24 }
 0x15d   : > { %1435 = vst [vmem:[%s2459_s20 + $0x8] sm:$0xff] %v1419_v27 }
 0x15e   : > { %v1334_v29 = vpop.f32.mrf.mxu2  ;;  %v1238_v33 = vpop.f32.mrf.mxu0 }
 0x15f   : > { %v1383_v30 = vpop.f32.mrf.mxu3  ;;  %v1335_v31 = vadd.f32 %v1334_v29, %v1286_v8  ;;  %v1287_v35 = vpop.f32.mrf.mxu1  ;;  %v1239_v37 = vadd.f32 %v1238_v33, %v2425_v34 }
 0x161   : > { %v1384_v36 = vadd.f32 %v1383_v30, %v1335_v31  ;;  %v1288_v39 = vadd.f32 %v1287_v35, %v1239_v37 }
 0x163   : > { %v1420_v38 = vadd.f32 %v2455_v11, %v1384_v36 }
 0x165   : > { %1436 = vst [vmem:[%s2459_s20 + $0x10] sm:$0xff] %v1420_v38 }
 0x166   : > { %v1336_v40 = vpop.f32.mrf.mxu2  ;;  %v1241_v43 = vpop.f32.mrf.mxu0 }
 0x167   : > { %v1385_v42 = vpop.f32.mrf.mxu3  ;;  %v1337_v15 = vadd.f32 %v1336_v40, %v1288_v39  ;;  %v1290_v44 = vpop.f32.mrf.mxu1  ;;  %v1242_v46 = vadd.f32 %v1241_v43, %v2427_v41 }
 0x169   : > { %v1386_v45 = vadd.f32 %v1385_v42, %v1337_v15  ;;  %v1291_v48 = vadd.f32 %v1290_v44, %v1242_v46 }
 0x16b   : > { %v1421_v47 = vadd.f32 %v2455_v11, %v1386_v45 }
 0x16d   : > { %1437 = vst [vmem:[%s2459_s20 + $0x18] sm:$0xff] %v1421_v47 }
 0x16e   : > { %v1339_v49 = vpop.f32.mrf.mxu2  ;;  %v1243_v52 = vpop.f32.mrf.mxu0 }
 0x16f   : > { %v1388_v51 = vpop.f32.mrf.mxu3  ;;  %v1340_v34 = vadd.f32 %v1339_v49, %v1291_v48  ;;  %v1292_v55 = vpop.f32.mrf.mxu1  ;;  %v1244_v57 = vadd.f32 %v1243_v52, %v2429_v61 }
 0x171   : > { %v1389_v56 = vadd.f32 %v1388_v51, %v1340_v34  ;;  %v1293_v60 = vadd.f32 %v1292_v55, %v1244_v57 }
 0x173   : > { %v1422_v58 = vadd.f32 %v2455_v11, %v1389_v56 }
 0x175   : > { %1438 = vst [vmem:[%s2459_s20 + $0x20] sm:$0xff] %v1422_v58 }
 0x176   : > { %v1341_v63 = vpop.f32.mrf.mxu2  ;;  %v1246_v1 = vpop.f32.mrf.mxu0 }
 0x177   : > { %v1390_v0 = vpop.f32.mrf.mxu3  ;;  %v1342_v41 = vadd.f32 %v1341_v63, %v1293_v60  ;;  %v1295_v2 = vpop.f32.mrf.mxu1  ;;  %v1247_v6 = vadd.f32 %v1246_v1, %v2431_v4 }
 0x179   : > { %v1391_v5 = vadd.f32 %v1390_v0, %v1342_v41  ;;  %v1296_v9 = vadd.f32 %v1295_v2, %v1247_v6 }
 0x17b   : > { %v1423_v7 = vadd.f32 %v2455_v11, %v1391_v5 }
 0x17d   : > { %1439 = vst [vmem:[%s2459_s20 + $0x28] sm:$0xff] %v1423_v7 }
 0x17e   : > { %v1344_v10 = vpop.f32.mrf.mxu2  ;;  %v1248_v13 = vpop.f32.mrf.mxu0 }
 0x17f   : > { %v1393_v12 = vpop.f32.mrf.mxu3  ;;  %v1345_v61 = vadd.f32 %v1344_v10, %v1296_v9  ;;  %v1297_v14 = vpop.f32.mrf.mxu1  ;;  %v1249_v17 = vadd.f32 %v1248_v13, %v2433_v25 }
 0x181   : > { %v1394_v16 = vadd.f32 %v1393_v12, %v1345_v61  ;;  %v1298_v18 = vadd.f32 %v1297_v14, %v1249_v17 }
 0x183   : > { %v1424_v53 = vadd.f32 %v2455_v11, %v1394_v16 }
 0x185   : > { %1440 = vst [vmem:[%s2459_s20 + $0x30] sm:$0xff] %v1424_v53 }
 0x186   : > { %v1346_v19 = vpop.f32.mrf.mxu2  ;;  %v1251_v22 = vpop.f32.mrf.mxu0 }
 0x187   : > { %v1395_v21 = vpop.f32.mrf.mxu3  ;;  %v1347_v4 = vadd.f32 %v1346_v19, %v1298_v18  ;;  %v1300_v23 = vpop.f32.mrf.mxu1  ;;  %v1252_v26 = vadd.f32 %v1251_v22, %v2435_v32 }
 0x189   : > { %v1396_v24 = vadd.f32 %v1395_v21, %v1347_v4  ;;  %v1301_v8 = vadd.f32 %v1300_v23, %v1252_v26 }
 0x18b   : > { %v1425_v27 = vadd.f32 %v2455_v11, %v1396_v24 }
 0x18d   : > { %1441 = vst [vmem:[%s2459_s20 + $0x38] sm:$0xff] %v1425_v27 }
 0x18e   : > { %v1349_v29 = vpop.f32.mrf.mxu2  ;;  %v1253_v31 = vpop.f32.mrf.mxu0 }
 0x18f   : > { %v1398_v30 = vpop.f32.mrf.mxu3  ;;  %v1350_v25 = vadd.f32 %v1349_v29, %v1301_v8  ;;  %v1302_v33 = vpop.f32.mrf.mxu1  ;;  %v1254_v36 = vadd.f32 %v1253_v31, %v2437_v54 }
 0x191   : > { %v1399_v35 = vadd.f32 %v1398_v30, %v1350_v25  ;;  %v1303_v38 = vadd.f32 %v1302_v33, %v1254_v36 }
 0x193   : > { %v1426_v37 = vadd.f32 %v2455_v11, %v1399_v35 }
 0x195   : > { %1442 = vst [vmem:[%s2459_s20 + $0x40] sm:$0xff] %v1426_v37 }
 0x196   : > { %v1351_v39 = vpop.f32.mrf.mxu2  ;;  %v1256_v42 = vpop.f32.mrf.mxu0 }
 0x197   : > { %v1400_v40 = vpop.f32.mrf.mxu3  ;;  %v1352_v32 = vadd.f32 %v1351_v39, %v1303_v38  ;;  %v1305_v15 = vpop.f32.mrf.mxu1  ;;  %v1257_v44 = vadd.f32 %v1256_v42, %v2439_v62 }
 0x199   : > { %v1401_v43 = vadd.f32 %v1400_v40, %v1352_v32  ;;  %v1306_v46 = vadd.f32 %v1305_v15, %v1257_v44 }
 0x19b   : > { %v1427_v45 = vadd.f32 %v2455_v11, %v1401_v43 }
 0x19d   : > { %1443 = vst [vmem:[%s2459_s20 + $0x48] sm:$0xff] %v1427_v45 }
 0x19e   : > { %v1354_v47 = vpop.f32.mrf.mxu2  ;;  %v1258_v49 = vpop.f32.mrf.mxu0 }
 0x19f   : > { %v1403_v48 = vpop.f32.mrf.mxu3  ;;  %v1355_v54 = vadd.f32 %v1354_v47, %v1306_v46  ;;  %v1307_v51 = vpop.f32.mrf.mxu1  ;;  %v1259_v52 = vadd.f32 %v1258_v49, %v2441_v20 }
 0x1a1   : > { %v1404_v34 = vadd.f32 %v1403_v48, %v1355_v54  ;;  %v1308_v56 = vadd.f32 %v1307_v51, %v1259_v52 }
 0x1a3   : > { %v1428_v55 = vadd.f32 %v2455_v11, %v1404_v34 }
 0x1a5   : > { %1444 = vst [vmem:[%s2459_s20 + $0x50] sm:$0xff] %v1428_v55 }
 0x1a6   : > { %v1356_v57 = vpop.f32.mrf.mxu2  ;;  %v1261_v60 = vpop.f32.mrf.mxu0 }
 0x1a7   : > { %v1405_v58 = vpop.f32.mrf.mxu3  ;;  %v1357_v62 = vadd.f32 %v1356_v57, %v1308_v56  ;;  %v1310_v63 = vpop.f32.mrf.mxu1  ;;  %v1262_v41 = vadd.f32 %v1261_v60, %v2443_v28 }
 0x1a9   : > { %v1406_v0 = vadd.f32 %v1405_v58, %v1357_v62  ;;  %v1311_v2 = vadd.f32 %v1310_v63, %v1262_v41 }
 0x1ab   : > { %v1429_v1 = vadd.f32 %v2455_v11, %v1406_v0 }
 0x1ad   : > { %1445 = vst [vmem:[%s2459_s20 + $0x58] sm:$0xff] %v1429_v1 }
 0x1ae   : > { %v1359_v5 = vpop.f32.mrf.mxu2  ;;  %v1263_v7 = vpop.f32.mrf.mxu0 }
 0x1af   : > { %v1408_v6 = vpop.f32.mrf.mxu3  ;;  %v1360_v20 = vadd.f32 %v1359_v5, %v1311_v2  ;;  %v1312_v9 = vpop.f32.mrf.mxu1  ;;  %v1264_v12 = vadd.f32 %v1263_v7, %v2445_v50 }
 0x1b1   : > { %v1409_v10 = vadd.f32 %v1408_v6, %v1360_v20  ;;  %v1313_v13 = vadd.f32 %v1312_v9, %v1264_v12 }
 0x1b3   : > { %v1430_v61 = vadd.f32 %v2455_v11, %v1409_v10 }
 0x1b5   : > { %1446 = vst [vmem:[%s2459_s20 + $0x60] sm:$0xff] %v1430_v61 }
 0x1b6   : > { %v1361_v14 = vpop.f32.mrf.mxu2  ;;  %v1266_v17 = vpop.f32.mrf.mxu0 }
 0x1b7   : > { %v1410_v28 = vpop.f32.mrf.mxu3  ;;  %v1362_v16 = vadd.f32 %v1361_v14, %v1313_v13  ;;  %v1267_v18 = vadd.f32 %v1266_v17, %v2447_v59  ;;  %v1315_v19 = vpop.f32.mrf.mxu1 }
 0x1b9   : > { %v1411_v53 = vadd.f32 %v1410_v28, %v1362_v16  ;;  %v1316_v4 = vadd.f32 %v1315_v19, %v1267_v18 }
 0x1bb   : > { %v1431_v21 = vadd.f32 %v2455_v11, %v1411_v53 }
 0x1bd   : > { %1447 = vst [vmem:[%s2459_s20 + $0x68] sm:$0xff] %v1431_v21 }
 0x1be   : > { %v1364_v50 = vpop.f32.mrf.mxu2  ;;  %v1268_v24 = vpop.f32.mrf.mxu0 }
 0x1bf   : > { %v1413_v22 = vpop.f32.mrf.mxu3  ;;  %v1365_v23 = vadd.f32 %v1364_v50, %v1316_v4  ;;  %v1269_v27 = vadd.f32 %v1268_v24, %v2449_v3  ;;  %v1317_v29 = vpop.f32.mrf.mxu1 }
 0x1c1   : > { %v1414_v26 = vadd.f32 %v1413_v22, %v1365_v23  ;;  %v1318_v59 = vadd.f32 %v1317_v29, %v1269_v27 }
 0x1c3   : > { %v1432_v8 = vadd.f32 %v2455_v11, %v1414_v26 }
 0x1c5   : > { %1448 = vst [vmem:[%s2459_s20 + $0x70] sm:$0xff] %v1432_v8 }
 0x1c6   : > { %v1366_v30 = vpop.f32.mrf.mxu2 }
 0x1c7   : > { %v1367_v25 = vadd.f32 %v1366_v30, %v1318_v59  ;;  %v1415_v31 = vpop.f32.mrf.mxu3 }
 0x1c9   : > { %v1416_v33 = vadd.f32 %v1415_v31, %v1367_v25 }
 0x1cb   : > { %v1433_v3 = vadd.f32 %v2455_v11, %v1416_v33 }
 0x1cd   : > { %1449 = vst [vmem:[%s2459_s20 + $0x78] sm:$0xff] %v1433_v3 }
 0x1ce   : > { %2127 = shalt.err (!%p2124_p13)
}
 0x1cf   : > { %s2193_s29 = smov 128   ;;  %s2194_s7 = smov 256  }
 0x1d0   : > { %s2195_s11 = smov 8  }
 0x1d1   : > { %1932 = dma.vmem_to_hbm [thread:$0]  (%p2307_p0), %s1466_s8, 2048, %s1468_s10, %s1451_s15, %s2193_s29, %s2194_s7, %s2195_s11  }
 0x1d2 PF: > { %s1482_s20 = sand.u32 1, %s2166_s12   ;;  %p1946_p3 = pnand %p1593_p4, %p2311_p2 }
 0x1d3   : > { %s1483_s27 = scalar_lea.sflag [#allocation4], %s1482_s20 }
 0x1d4   : > { %p1947_p5 = pneg %p1946_p3 }
 0x1d6   : > { %2161 = dma.done.wait (%p1947_p5), %s1483_s27, 2048  }
 0x1d7   : > { %2163 = vsyncadd (%p1947_p5), %s1483_s27, 4294965248  ;;  %s20_s17 = sadd.s32 1, %s2186_s17   ;;  %s2555_s12 = smov %s2170_s13 }
 0x1d8   : > { %p17_p1 = scmp.ge.s32.totalorder %s20_s17, 4   ;;  %s2556_s13 = smov %s2174_s14 }
 0x1d9   : > { %s2557_s14 = smov %s2267_s24  ;;  %s2558_s15 = smov %s2182_s16 }
 0x1da   : > { %s2559_s16 = smov %s2561_s18  ;;  %19 = sbr.rel (!%p17_p1) target bundleno = 7 (0x7), region = 98 }
 0x1df   :  { %1489 = vsyncpa [#allocation3], 1 }
 0x1e0   :  { %1491 = vsyncpa [#allocation3 + $0x1], 1 }
 0x1e1   :  { %1492 = vsyncpa [#allocation6], 1 }
 0x1e2   :  { %1494 = vsyncpa [#allocation6 + $0x1], 1 }
 0x1e3   :  { %1495 = vsyncpa [#allocation4], 1 }
 0x1e4   :  { %1497 = vsyncpa [#allocation4 + $0x1], 1 }

</bundles_post_ra>
